<compile_context>
chip_gen: v5e
topology: v5e:2x2
jax: 0.10.0
libtpu: 0.0.40
codegen_flags: <defaults>
</compile_context>

<pallas_src>
import math

import jax
import jax.numpy as jnp
from jax.experimental import pallas as pl
from jax.experimental.pallas import tpu as pltpu

_LANES = 128


def _cdiv(a, b):
    return -(-a // b)


def _round_up(a, b):
    return _cdiv(a, b) * b


def _tpu_plan():
    """Per-chip plan: (num_tensorcores, double-buffered-input budget, vmem cap)."""
    kind = ""
    try:
        kind = jax.devices()[0].device_kind.lower()
    except Exception:
        pass
    # v5e / v6e: single TensorCore, 128 MiB VMEM.  v7x-class (and unknown):
    # assume 2 TensorCores and only 64 MiB VMEM per core -> plan conservatively.
    single_tc = ("v5" in kind) or ("v6" in kind)
    n_tc = 1 if single_tc else 2
    vmem = (128 if single_tc else 64) * 1024 * 1024
    try:  # use the real VMEM capacity when the API exposes it
        info = pltpu.get_tpu_info()
        for name in ("vmem_capacity_bytes", "vmem_size_bytes"):
            v = getattr(info, name, None)
            if v:
                v = int(v)
                vmem = v if single_tc else min(v, vmem)
                break
    except Exception:
        pass
    # ~3/8 of VMEM for double-buffered input blocks; scoped plan capped at ~3/4.
    return n_tc, (vmem * 3) // 8, (vmem * 3) // 4


def _make_kernel(r_rows, tr, steps, nblocks, needs_mask):
    def kernel(x_ref, t_ref, out_ref, inter_acc, s1_acc, s2_acc):
        c = pl.program_id(0)
        k = pl.program_id(1)

        @pl.when(k == 0)
        def _():
            inter_acc[...] = jnp.zeros_like(inter_acc)
            s1_acc[...] = jnp.zeros_like(s1_acc)
            s2_acc[...] = jnp.zeros_like(s2_acc)

        # Hot path: EUP sigmoid (jax.nn.sigmoid lowers via lax.logistic; the
        # explicit tanh form is a drop-in swap if a bundle dump ever shows a
        # true f32 divide) + VPU mul, then a per-step reduction over the row
        # axis straight into tiny accumulators (no full-tile f32 RMW).
        probs = jax.nn.sigmoid(x_ref[...].astype(jnp.float32))   # (N, TR, 128)
        tgt = t_ref[...].astype(jnp.float32)                     # (N, TR, 128)

        def accumulate(p, t):
            inter_acc[...] += jnp.sum(p * t, axis=1)   # (N, 128)
            s1_acc[...] += jnp.sum(p, axis=1)
            s2_acc[...] += jnp.sum(t, axis=1)

        if needs_mask:
            b = c * steps + k                 # logical (unclamped) block index

            @pl.when(b < nblocks - 1)         # interior blocks: mask-free
            def _():
                accumulate(probs, tgt)

            @pl.when(b >= nblocks - 1)        # ragged tail / phantom blocks
            def _():
                rows_valid = r_rows - b * tr  # <= 0 for phantom blocks
                rows = jax.lax.broadcasted_iota(jnp.int32, probs.shape, 1)
                m = rows < rows_valid
                accumulate(jnp.where(m, probs, 0.0), jnp.where(m, tgt, 0.0))
        else:
            accumulate(probs, tgt)

        # Per-split epilogue: lane-dense (N, 128) partial sums written once.
        @pl.when(k == pl.num_programs(1) - 1)
        def _():
            out_ref[0, 0, :, :] = inter_acc[...]
            out_ref[0, 1, :, :] = s1_acc[...]
            out_ref[0, 2, :, :] = s2_acc[...]

    return kernel


def soft_dice_loss(logits, targets, *, smooth=1.0):
    """Pallas implementation of SoftDiceLoss.forward.

    logits, targets: (N, ...) arrays of identical shape.  Pass bf16 logits and
    bf16 {0,1} targets to minimize the HBM read of this bandwidth-bound kernel;
    sigmoid and accumulation run in f32 regardless.  Returns a float32 scalar.
    """
    num = logits.shape[0]
    d = math.prod(logits.shape[1:])
    lanes = _LANES
    r = _cdiv(d, lanes)                 # 128-lane feature rows

    n_tc, input_budget, vmem_cap = _tpu_plan()

    # ---- repack as (N, R, 128); free when D is a multiple of 128 (common case).
    x2 = logits.reshape(num, d)
    t2 = targets.reshape(num, d)
    lane_pad = r * lanes - d
    if lane_pad:
        # TODO(synk): a <128-element sliver still makes XLA rewrite the whole
        # tensor; lane-aligned D skips this branch entirely (zero extra HBM).
        neg = (float(jnp.finfo(x2.dtype).min)
               if jnp.issubdtype(x2.dtype, jnp.floating) else -1e9)
        x2 = jnp.pad(x2, ((0, 0), (0, lane_pad)), constant_values=neg)  # sigmoid -> 0
        t2 = jnp.pad(t2, ((0, 0), (0, lane_pad)), constant_values=0)
    x3 = x2.reshape(num, r, lanes)
    t3 = t2.reshape(num, r, lanes)

    # ---- block sizing from the honest VMEM budget (both dtypes, double buffer).
    x_row = num * lanes * x3.dtype.itemsize      # bytes per 128-lane feature row
    t_row = num * lanes * t3.dtype.itemsize
    tr = (input_budget // (2 * (x_row + t_row))) // 16 * 16
    tr = max(tr, 16)                             # minimal dense (bf16/f32) row tile
    tr = min(tr, _round_up(_cdiv(r, n_tc), 16))  # at most one split's share
    if tr >= r:
        tr = r                                   # one block spans every row
    nblocks = _cdiv(r, tr)                       # real row blocks
    nsplit = max(1, min(n_tc, nblocks))          # "parallel" splits (2 on v7x)
    steps = _cdiv(nblocks, nsplit)               # "arbitrary" reduction steps/split
    needs_mask = (nsplit * steps * tr) != r      # ragged tail and/or phantom blocks

    def row_block(c, k):
        b = c * steps + k
        if needs_mask:                           # phantom blocks re-read the last
            b = jnp.minimum(b, nblocks - 1)      # real block; the mask zeroes them
        return b

    idx = lambda c, k: (0, row_block(c, k), 0)

    # Scoped-VMEM plan derived from the actual blocks, so the plan never exceeds
    # the limit; default double buffering kept (pl.Buffered(3) only if a trace
    # still shows exposed DMA after the block-size increase).
    in_bytes = 2 * tr * (x_row + t_row)                    # 2 bufs x both inputs
    out_bytes = 2 * 3 * num * lanes * 4                    # 2 bufs x (1,3,N,128) f32
    acc_bytes = 3 * _round_up(num, 8) * lanes * 4          # three (N,128) f32 accs
    needed = in_bytes + out_bytes + acc_bytes
    vmem_limit = max(needed + (2 << 20), min(32 << 20, vmem_cap))

    partials = pl.pallas_call(
        _make_kernel(r, tr, steps, nblocks, needs_mask),
        out_shape=jax.ShapeDtypeStruct((nsplit, 3, num, lanes), jnp.float32),
        grid_spec=pltpu.PrefetchScalarGridSpec(
            num_scalar_prefetch=0,
            grid=(nsplit, steps),
            in_specs=[
                pl.BlockSpec((num, tr, lanes), idx),
                pl.BlockSpec((num, tr, lanes), idx),
            ],
            out_specs=pl.BlockSpec((1, 3, num, lanes), lambda c, k: (c, 0, 0, 0)),
            scratch_shapes=[
                pltpu.VMEM((num, lanes), jnp.float32),   # sum(probs * targets)
                pltpu.VMEM((num, lanes), jnp.float32),   # sum(probs)
                pltpu.VMEM((num, lanes), jnp.float32),   # sum(targets)
            ],
        ),
        compiler_params=pltpu.CompilerParams(
            dimension_semantics=("parallel", "arbitrary"),
            vmem_limit_bytes=int(vmem_limit),
        ),
    )(x3, t3)

    # Tiny JAX epilogue: combine per-split / per-lane partial sums.
    inter = partials[:, 0].sum(axis=(0, 2))   # (N,)
    s1 = partials[:, 1].sum(axis=(0, 2))
    s2 = partials[:, 2].sum(axis=(0, 2))
    score = 2.0 * (inter + smooth) / (s1 + s2 + smooth)
    return (1.0 - score.sum() / num).astype(jnp.float32)


def _soft_dice_loss_ref(logits, targets):
    num = logits.shape[0]
    smooth = 1.0
    probs = jax.nn.sigmoid(logits.astype(jnp.float32)).reshape(num, -1)
    m2 = targets.astype(jnp.float32).reshape(num, -1)
    inter = (probs * m2).sum(axis=1)
    score = 2.0 * (inter + smooth) / (probs.sum(axis=1) + m2.sum(axis=1) + smooth)
    return 1.0 - score.sum() / num


if __name__ == "__main__":
    key = jax.random.PRNGKey(0)
    k1, k2 = jax.random.split(key)
    N, C, H, W = 2, 4, 16, 16
    # HBM-bound kernel: feed bf16 logits (sigmoid/accumulation stay f32 in-kernel)
    # and bf16 {0,1} targets -> 4 B/elem instead of 6 B/elem of HBM read.
    logits = jax.random.normal(k1, (N, C, H, W), dtype=jnp.float32).astype(jnp.bfloat16)
    targets = (jax.random.uniform(k2, (N, C, H, W)) > 0.5).astype(jnp.bfloat16)

    loss = jax.block_until_ready(jax.jit(soft_dice_loss)(logits, targets))
    ref = jax.block_until_ready(_soft_dice_loss_ref(logits, targets))

    assert jnp.allclose(loss, ref, atol=2e-5, rtol=2e-5), (loss, ref)
    print("KERNEL_OK")
</pallas_src>

<mosaic_0001>
module attributes {stable_mosaic.version = 11 : i64} {
  func.func @kernel(%arg0: i32, %arg1: i32, %arg2: memref<2x8x128xbf16, #tpu.memory_space<vmem>>, %arg3: memref<2x8x128xbf16, #tpu.memory_space<vmem>>, %arg4: memref<1x3x2x128xf32, #tpu.memory_space<vmem>>, %arg5: memref<2x128xf32, #tpu.memory_space<vmem>>, %arg6: memref<2x128xf32, #tpu.memory_space<vmem>>, %arg7: memref<2x128xf32, #tpu.memory_space<vmem>>) attributes {dimension_semantics = [#tpu.dimension_semantics<parallel>, #tpu.dimension_semantics<arbitrary>], iteration_bounds = array<i64: 1, 1>, scalar_prefetch = 0 : i64, scratch_operands = 3 : i64, tpu.core_type = #tpu.core_type<tc>, window_params = [{transform_indices = @transform_0, window_bounds = array<i64: 2, 8, 128>}, {transform_indices = @transform_1, window_bounds = array<i64: 2, 8, 128>}, {transform_indices = @transform_2, window_bounds = array<i64: 1, 3, 2, 128>}]} {
    %c0_i32 = arith.constant 0 : i32
    %0 = arith.cmpi eq, %arg1, %c0_i32 : i32
    %1 = arith.extui %0 : i1 to i32
    %c0_i32_0 = arith.constant 0 : i32
    %2 = arith.cmpi ne, %1, %c0_i32_0 : i32
    scf.if %2 {
      %cst_23 = arith.constant 0.000000e+00 : f32
      %28 = vector.broadcast %cst_23 : f32 to vector<2x128xf32>
      %c0_24 = arith.constant 0 : index
      %c0_25 = arith.constant 0 : index
      %29 = vector.load %arg5[%c0_24, %c0_25] : memref<2x128xf32, #tpu.memory_space<vmem>>, vector<2x128xf32>
      tpu.vector_store %arg5[%c0_24, %c0_25], %28 {strides = array<i32>} : memref<2x128xf32, #tpu.memory_space<vmem>>, vector<2x128xf32>,
      %cst_26 = arith.constant 0.000000e+00 : f32
      %30 = vector.broadcast %cst_26 : f32 to vector<2x128xf32>
      %c0_27 = arith.constant 0 : index
      %c0_28 = arith.constant 0 : index
      %31 = vector.load %arg6[%c0_27, %c0_28] : memref<2x128xf32, #tpu.memory_space<vmem>>, vector<2x128xf32>
      tpu.vector_store %arg6[%c0_27, %c0_28], %30 {strides = array<i32>} : memref<2x128xf32, #tpu.memory_space<vmem>>, vector<2x128xf32>,
      %cst_29 = arith.constant 0.000000e+00 : f32
      %32 = vector.broadcast %cst_29 : f32 to vector<2x128xf32>
      %c0_30 = arith.constant 0 : index
      %c0_31 = arith.constant 0 : index
      %33 = vector.load %arg7[%c0_30, %c0_31] : memref<2x128xf32, #tpu.memory_space<vmem>>, vector<2x128xf32>
      tpu.vector_store %arg7[%c0_30, %c0_31], %32 {strides = array<i32>} : memref<2x128xf32, #tpu.memory_space<vmem>>, vector<2x128xf32>,
    } else {
    }
    %c0 = arith.constant 0 : index
    %c0_1 = arith.constant 0 : index
    %c0_2 = arith.constant 0 : index
    %3 = vector.load %arg2[%c0, %c0_1, %c0_2] : memref<2x8x128xbf16, #tpu.memory_space<vmem>>, vector<2x8x128xbf16>
    %4 = arith.extf %3 : vector<2x8x128xbf16> to vector<2x8x128xf32>
    %5 = arith.negf %4 : vector<2x8x128xf32>
    %6 = math.exp %5 : vector<2x8x128xf32>
    %cst = arith.constant 1.000000e+00 : f32
    %7 = vector.broadcast %cst : f32 to vector<2x8x128xf32>
    %8 = arith.addf %7, %6 : vector<2x8x128xf32>
    %9 = arith.divf %7, %8 : vector<2x8x128xf32>
    %c0_3 = arith.constant 0 : index
    %c0_4 = arith.constant 0 : index
    %c0_5 = arith.constant 0 : index
    %10 = vector.load %arg3[%c0_3, %c0_4, %c0_5] : memref<2x8x128xbf16, #tpu.memory_space<vmem>>, vector<2x8x128xbf16>
    %11 = arith.extf %10 : vector<2x8x128xbf16> to vector<2x8x128xf32>
    %c0_6 = arith.constant 0 : index
    %c0_7 = arith.constant 0 : index
    %12 = vector.load %arg5[%c0_6, %c0_7] : memref<2x128xf32, #tpu.memory_space<vmem>>, vector<2x128xf32>
    %13 = arith.mulf %9, %11 : vector<2x8x128xf32>
    %cst_8 = arith.constant dense<0.000000e+00> : vector<2x128xf32>
    %14 = vector.multi_reduction <add>, %13, %cst_8 [1] : vector<2x8x128xf32> to vector<2x128xf32>
    %15 = arith.addf %12, %14 : vector<2x128xf32>
    %c0_9 = arith.constant 0 : index
    %c0_10 = arith.constant 0 : index
    %16 = vector.load %arg5[%c0_9, %c0_10] : memref<2x128xf32, #tpu.memory_space<vmem>>, vector<2x128xf32>
    tpu.vector_store %arg5[%c0_9, %c0_10], %15 {strides = array<i32>} : memref<2x128xf32, #tpu.memory_space<vmem>>, vector<2x128xf32>,
    %c0_11 = arith.constant 0 : index
    %c0_12 = arith.constant 0 : index
    %17 = vector.load %arg6[%c0_11, %c0_12] : memref<2x128xf32, #tpu.memory_space<vmem>>, vector<2x128xf32>
    %cst_13 = arith.constant dense<0.000000e+00> : vector<2x128xf32>
    %18 = vector.multi_reduction <add>, %9, %cst_13 [1] : vector<2x8x128xf32> to vector<2x128xf32>
    %19 = arith.addf %17, %18 : vector<2x128xf32>
    %c0_14 = arith.constant 0 : index
    %c0_15 = arith.constant 0 : index
    %20 = vector.load %arg6[%c0_14, %c0_15] : memref<2x128xf32, #tpu.memory_space<vmem>>, vector<2x128xf32>
    tpu.vector_store %arg6[%c0_14, %c0_15], %19 {strides = array<i32>} : memref<2x128xf32, #tpu.memory_space<vmem>>, vector<2x128xf32>,
    %c0_16 = arith.constant 0 : index
    %c0_17 = arith.constant 0 : index
    %21 = vector.load %arg7[%c0_16, %c0_17] : memref<2x128xf32, #tpu.memory_space<vmem>>, vector<2x128xf32>
    %cst_18 = arith.constant dense<0.000000e+00> : vector<2x128xf32>
    %22 = vector.multi_reduction <add>, %11, %cst_18 [1] : vector<2x8x128xf32> to vector<2x128xf32>
    %23 = arith.addf %21, %22 : vector<2x128xf32>
    %c0_19 = arith.constant 0 : index
    %c0_20 = arith.constant 0 : index
    %24 = vector.load %arg7[%c0_19, %c0_20] : memref<2x128xf32, #tpu.memory_space<vmem>>, vector<2x128xf32>
    tpu.vector_store %arg7[%c0_19, %c0_20], %23 {strides = array<i32>} : memref<2x128xf32, #tpu.memory_space<vmem>>, vector<2x128xf32>,
    %c0_i32_21 = arith.constant 0 : i32
    %25 = arith.cmpi eq, %arg1, %c0_i32_21 : i32
    %26 = arith.extui %25 : i1 to i32
    %c0_i32_22 = arith.constant 0 : i32
    %27 = arith.cmpi ne, %26, %c0_i32_22 : i32
    scf.if %27 {
      %c0_23 = arith.constant 0 : index
      %c0_24 = arith.constant 0 : index
      %28 = vector.load %arg5[%c0_23, %c0_24] : memref<2x128xf32, #tpu.memory_space<vmem>>, vector<2x128xf32>
      %c0_25 = arith.constant 0 : index
      %c0_26 = arith.constant 0 : index
      %c0_27 = arith.constant 0 : index
      %c0_28 = arith.constant 0 : index
      %29 = vector.load %arg4[%c0_25, %c0_26, %c0_27, %c0_28] : memref<1x3x2x128xf32, #tpu.memory_space<vmem>>, vector<1x1x2x128xf32>
      %30 = vector.shape_cast %29 : vector<1x1x2x128xf32> to vector<2x128xf32>
      %31 = vector.shape_cast %28 : vector<2x128xf32> to vector<1x1x2x128xf32>
      tpu.vector_store %arg4[%c0_25, %c0_26, %c0_27, %c0_28], %31 {strides = array<i32>} : memref<1x3x2x128xf32, #tpu.memory_space<vmem>>, vector<1x1x2x128xf32>,
      %c0_29 = arith.constant 0 : index
      %c0_30 = arith.constant 0 : index
      %32 = vector.load %arg6[%c0_29, %c0_30] : memref<2x128xf32, #tpu.memory_space<vmem>>, vector<2x128xf32>
      %c0_31 = arith.constant 0 : index
      %c1 = arith.constant 1 : index
      %c0_32 = arith.constant 0 : index
      %c0_33 = arith.constant 0 : index
      %33 = vector.load %arg4[%c0_31, %c1, %c0_32, %c0_33] : memref<1x3x2x128xf32, #tpu.memory_space<vmem>>, vector<1x1x2x128xf32>
      %34 = vector.shape_cast %33 : vector<1x1x2x128xf32> to vector<2x128xf32>
      %35 = vector.shape_cast %32 : vector<2x128xf32> to vector<1x1x2x128xf32>
      tpu.vector_store %arg4[%c0_31, %c1, %c0_32, %c0_33], %35 {strides = array<i32>} : memref<1x3x2x128xf32, #tpu.memory_space<vmem>>, vector<1x1x2x128xf32>,
      %c0_34 = arith.constant 0 : index
      %c0_35 = arith.constant 0 : index
      %36 = vector.load %arg7[%c0_34, %c0_35] : memref<2x128xf32, #tpu.memory_space<vmem>>, vector<2x128xf32>
      %c0_36 = arith.constant 0 : index
      %c2 = arith.constant 2 : index
      %c0_37 = arith.constant 0 : index
      %c0_38 = arith.constant 0 : index
      %37 = vector.load %arg4[%c0_36, %c2, %c0_37, %c0_38] : memref<1x3x2x128xf32, #tpu.memory_space<vmem>>, vector<1x1x2x128xf32>
      %38 = vector.shape_cast %37 : vector<1x1x2x128xf32> to vector<2x128xf32>
      %39 = vector.shape_cast %36 : vector<2x128xf32> to vector<1x1x2x128xf32>
      tpu.vector_store %arg4[%c0_36, %c2, %c0_37, %c0_38], %39 {strides = array<i32>} : memref<1x3x2x128xf32, #tpu.memory_space<vmem>>, vector<1x1x2x128xf32>,
    } else {
    }
    return
  }
  func.func @transform_0(%arg0: i32, %arg1: i32) -> (i32, i32, i32) {
    %c1_i32 = arith.constant 1 : i32
    %0 = arith.muli %arg0, %c1_i32 : i32
    %1 = arith.addi %0, %arg1 : i32
    %c0_i32 = arith.constant 0 : i32
    %c0_i32_0 = arith.constant 0 : i32
    %c0_i32_1 = arith.constant 0 : i32
    return %c0_i32, %1, %c0_i32_0 : i32, i32, i32
  }
  func.func @transform_1(%arg0: i32, %arg1: i32) -> (i32, i32, i32) {
    %c1_i32 = arith.constant 1 : i32
    %0 = arith.muli %arg0, %c1_i32 : i32
    %1 = arith.addi %0, %arg1 : i32
    %c0_i32 = arith.constant 0 : i32
    %c0_i32_0 = arith.constant 0 : i32
    %c0_i32_1 = arith.constant 0 : i32
    return %c0_i32, %1, %c0_i32_0 : i32, i32, i32
  }
  func.func @transform_2(%arg0: i32, %arg1: i32) -> (i32, i32, i32, i32) {
    %c0_i32 = arith.constant 0 : i32
    %c0_i32_0 = arith.constant 0 : i32
    %c0_i32_1 = arith.constant 0 : i32
    %c0_i32_2 = arith.constant 0 : i32
    return %arg0, %c0_i32, %c0_i32_0, %c0_i32_1 : i32, i32, i32, i32
  }
}

</mosaic_0001>

<bundles_post_ra>
// kernel: soft_dice_loss.1
= control target key start
LH: loop header
LB: loop body
LE: loop exit
PB: predicated region body
PF: predicated region fallthrough
CT: control target
= control target key end

     0   :  { %v206_v0 = vmov 0.0   ;;  %vm115_vm0 = vcmask 1041409   ;;  %s240_s0 = inlined_call_operand.vmem [shape: bf16[2,8,128], index: 0, kind: input, shape index: {}]   ;;  %s241_s1 = inlined_call_operand.vmem [shape: bf16[2,8,128], index: 1, kind: input, shape index: {}]   ;;  %s242_s2 = inlined_call_operand.vmem [shape: f32[1,3,2,128], index: 2, kind: output, shape index: {}]  }
   0x1   :  { %49 = vst [vmem:[#allocation2] sm:$0x3] %v206_v0  ;;  %v190_v1 = vld [vmem:[%s240_s0] sm:$0xff]  }
   0x2   :  { %v194_v2 = vld [vmem:[%s241_s1] sm:$0xff]   ;;  %50 = vst [vmem:[#allocation3] sm:$0x3] %v206_v0  ;;  %v191_v3 = vunpack.c.l.bf16 %v190_v1  ;;  %v192_v4 = vunpack.c.h.bf16 %v190_v1 }
   0x3   :  { %v195_v5 = vunpack.c.l.bf16 %v194_v2  ;;  %v196_v6 = vunpack.c.h.bf16 %v194_v2  ;;  %51 = vst [vmem:[#allocation4] sm:$0x3] %v206_v0 }
   0x4   :  { %v185_v7 = vmul.f32 -1.442695, %v191_v3  ;;  %v186_v8 = vmul.f32 -1.442695, %v192_v4 }
   0x5   :  { %v140_v9 = vrot.slane %v195_v5, 4  ;;  %v146_v10 = vrot.slane %v196_v6, 4 }
   0x6   :  { %198 = vpow2.f32 %v185_v7 }
   0x7   :  { %v141_v11 = vadd.f32 %v195_v5, %v140_v9  ;;  %v147_v12 = vadd.f32 %v196_v6, %v146_v10  ;;  %200 = vpow2.f32 %v186_v8 }
   0x9   :  { %v142_v13 = vrot.slane %v141_v11, 2  ;;  %v148_v14 = vrot.slane %v147_v12, 2  ;;  %v120_v8 = vld [vmem:[#allocation3] sm:$0x3] }
   0xa   :  { %v139_v25 = vld [vmem:[#allocation4] sm:$0x3] }
   0xb   :  { %v143_v15 = vadd.f32 %v142_v13, %v141_v11  ;;  %v149_v16 = vadd.f32 %v148_v14, %v147_v12  ;;  %v98_v11 = vld [vmem:[#allocation2] sm:$0x3] }
   0xc   :  { %v199_v17 = vpop.eup %198 }
   0xd   :  { %v144_v18 = vrot.slane %v143_v15, 1  ;;  %v150_v19 = vrot.slane %v149_v16, 1  ;;  %v201_v20 = vpop.eup %200  ;;  %v62_v21 = vadd.f32 1.0, %v199_v17 }
   0xe   :  { %v63_v22 = vadd.f32 1.0, %v201_v20 }
   0xf   :  { %v145_v23 = vadd.f32 %v144_v18, %v143_v15  ;;  %v151_v24 = vadd.f32 %v150_v19, %v149_v16  ;;  %202 = vrcp.f32 %v62_v21  ;;  %vm69_vm1 = vweird.f32 %v62_v21 }
  0x10   :  { %204 = vrcp.f32 %v63_v22  ;;  %v75_v31 = vand.u32 2147483648, %v62_v21  ;;  %v73_v34 = vand.u32 2147483647, %v62_v21  ;;  %v90_v35 = vand.u32 2147483648, %v63_v22 }
  0x11   :  { %v154_v26 = vsel %vm115_vm0, %v151_v24, %v145_v23  ;;  %vm84_vm3 = vweird.f32 %v63_v22  ;;  %v88_v37 = vand.u32 2147483647, %v63_v22 }
  0x12   :  { %v156_v27 = vadd.f32 %v154_v26, %v139_v25  ;;  %v76_v39 = vor.u32 1.1754944e-38, %v75_v31  ;;  %vm74_vm6 = vcmp.eq.f32.partialorder %v73_v34, 8.507059e+37  ;;  %v91_v43 = vor.u32 1.1754944e-38, %v90_v35 }
  0x13   :  { %vm89_vm8 = vcmp.eq.f32.partialorder %v88_v37, 8.507059e+37 }
  0x14   :  { %157 = vst [vmem:[#allocation4] sm:$0x3] %v156_v27 }
  0x15   :  { %v203_v28 = vpop.eup %202 }
  0x16   :  { %v205_v29 = vpop.eup %204  ;;  %v65_v30 = vmul.f32 %v203_v28, %v62_v21  ;;  %vm70_vm2 = vweird.f32 %v203_v28 }
  0x17   :  { %v80_v32 = vmul.f32 %v205_v29, %v63_v22  ;;  %vm85_vm4 = vweird.f32 %v205_v29  ;;  %vm71_vm5 = vmor %vm69_vm1, %vm70_vm2 }
  0x18   :  { %v66_v33 = vsub.f32 1.0, %v65_v30  ;;  %vm86_vm7 = vmor %vm84_vm3, %vm85_vm4 }
  0x19   :  { %v81_v36 = vsub.f32 1.0, %v80_v32 }
  0x1a   :  { %v67_v38 = vmul.f32 %v203_v28, %v66_v33 }
  0x1b   :  { %v82_v40 = vmul.f32 %v205_v29, %v81_v36  ;;  %v166_v41 = vld [vmem:[#allocation4] sm:$0x3] }
  0x1c   :  { %v68_v42 = vadd.f32 %v203_v28, %v67_v38  ;;  %188 = vst [vmem:[%s242_s2 + $0x4] sm:$0x3] %v166_v41 }
  0x1d   :  { %v83_v44 = vadd.f32 %v205_v29, %v82_v40 }
  0x1e   :  { %v72_v45 = vsel %vm71_vm5, %v203_v28, %v68_v42 }
  0x1f   :  { %v77_v46 = vsel %vm74_vm6, %v76_v39, %v72_v45  ;;  %v87_v47 = vsel %vm86_vm7, %v205_v29, %v83_v44 }
  0x20   :  { %v92_v48 = vsel %vm89_vm8, %v91_v43, %v87_v47  ;;  %v99_v49 = vmul.f32 %v195_v5, %v77_v46  ;;  %v121_v50 = vrot.slane %v77_v46, 4 }
  0x21   :  { %v100_v51 = vmul.f32 %v196_v6, %v92_v48  ;;  %v127_v52 = vrot.slane %v92_v48, 4 }
  0x22   :  { %v101_v53 = vrot.slane %v99_v49, 4  ;;  %v122_v54 = vadd.f32 %v121_v50, %v77_v46 }
  0x23   :  { %v107_v55 = vrot.slane %v100_v51, 4  ;;  %v128_v56 = vadd.f32 %v127_v52, %v92_v48 }
  0x24   :  { %v102_v57 = vadd.f32 %v101_v53, %v99_v49  ;;  %v123_v58 = vrot.slane %v122_v54, 2 }
  0x25   :  { %v108_v59 = vadd.f32 %v107_v55, %v100_v51  ;;  %v129_v60 = vrot.slane %v128_v56, 2 }
  0x26   :  { %v103_v61 = vrot.slane %v102_v57, 2  ;;  %v124_v62 = vadd.f32 %v123_v58, %v122_v54 }
  0x27   :  { %v109_v63 = vrot.slane %v108_v59, 2  ;;  %v130_v0 = vadd.f32 %v129_v60, %v128_v56 }
  0x28   :  { %v104_v1 = vadd.f32 %v103_v61, %v102_v57  ;;  %v125_v2 = vrot.slane %v124_v62, 1 }
  0x29   :  { %v110_v3 = vadd.f32 %v109_v63, %v108_v59  ;;  %v131_v4 = vrot.slane %v130_v0, 1 }
  0x2a   :  { %v105_v5 = vrot.slane %v104_v1, 1  ;;  %v126_v7 = vadd.f32 %v125_v2, %v124_v62 }
  0x2b   :  { %v111_v6 = vrot.slane %v110_v3, 1  ;;  %v132_v9 = vadd.f32 %v131_v4, %v130_v0 }
  0x2c   :  { %v106_v10 = vadd.f32 %v105_v5, %v104_v1 }
  0x2d   :  { %v112_v12 = vadd.f32 %v111_v6, %v110_v3  ;;  %v135_v13 = vsel %vm115_vm0, %v132_v9, %v126_v7 }
  0x2e   :  { %v137_v14 = vadd.f32 %v135_v13, %v120_v8 }
  0x2f   :  { %v116_v15 = vsel %vm115_vm0, %v112_v12, %v106_v10 }
  0x30   :  { %v118_v16 = vadd.f32 %v116_v15, %v98_v11  ;;  %138 = vst [vmem:[#allocation3] sm:$0x3] %v137_v14 }
  0x32   :  { %119 = vst [vmem:[#allocation2] sm:$0x3] %v118_v16 }
  0x37   :  { %v163_v17 = vld [vmem:[#allocation3] sm:$0x3] }
  0x38   :  { %187 = vst [vmem:[%s242_s2 + $0x2] sm:$0x3] %v163_v17 }
  0x39   :  { %v161_v18 = vld [vmem:[#allocation2] sm:$0x3] }
  0x3a   :  { %162 = vst [vmem:[%s242_s2] sm:$0x3] %v161_v18 }

</bundles_post_ra>
